<compile_context>
chip_gen: v5e
topology: v5e:2x2
jax: 0.10.0
libtpu: 0.0.40
codegen_flags: <defaults>
</compile_context>

<pallas_src>
import jax
import jax.numpy as jnp
from jax import lax
from jax.experimental import pallas as pl
from jax.experimental.pallas import tpu as pltpu


def lstm_kernel(x_ref, wih_ref, whh_ref, b_ref, wfc_ref, bfc_ref,
                out_ref, h_scr, c_scr, pre_scr):
    # x_ref  : (Bb, Tc, D)  f32   time-chunk of the batch-first input
    # wih_ref: (D, 4H)      bf16  input->gate weights, gate order [i, f, g, o]
    # whh_ref: (H, 4H)      bf16  hidden->gate weights
    # b_ref  : (1, 4H)      f32   combined bias (b_ih + b_hh)
    # wfc_ref: (1, H)       f32   final Linear weight
    # bfc_ref: (1, 1)       f32   final Linear bias (SMEM scalar)
    # out_ref: (Bb, 1)      f32
    # h_scr/c_scr: (Bb, H)  f32   recurrent state, persists across the T grid
    # pre_scr: (Bb, Tc, 4H) f32   VMEM-resident per-chunk input projection
    t_blk = pl.program_id(1)
    n_t = pl.num_programs(1)
    Bb, Tc, D = x_ref.shape
    H = h_scr.shape[1]

    # h0 = c0 = 0 at the start of every batch block's time sweep
    # (matches torch.zeros in the module's forward).
    @pl.when(t_blk == 0)
    def _():
        h_scr[...] = jnp.zeros_like(h_scr)
        c_scr[...] = jnp.zeros_like(c_scr)

    # Hoisted input projection for the whole chunk: one (Bb*Tc, D)@(D, 4H)
    # MXU matmul (bf16 operands, f32 accumulate), spilled to VMEM scratch so
    # it does not stay live in vregs across the recurrence.
    x2 = x_ref[...].reshape(Bb * Tc, D).astype(jnp.bfloat16)
    pre = jnp.dot(x2, wih_ref[...], preferred_element_type=jnp.float32)
    pre_scr[...] = (pre + b_ref[...]).reshape(Bb, Tc, 4 * H)  # bias added once, f32

    # Loop-invariant weight load hoisted out of the recurrence.
    whh = whh_ref[...]                                        # bf16 (H, 4H)

    def step(t, carry):
        h, c = carry
        # Ref slice per step (plain VMEM load) instead of slicing a huge
        # carried value inside an unrolled Python loop.
        g_pre = pre_scr[:, t, :]                              # (Bb, 4H) f32
        gates = jnp.dot(h.astype(jnp.bfloat16), whh,
                        preferred_element_type=jnp.float32) + g_pre
        i = jax.nn.sigmoid(gates[:, 0 * H:1 * H])
        f = jax.nn.sigmoid(gates[:, 1 * H:2 * H])
        g = jnp.tanh(gates[:, 2 * H:3 * H])
        o = jax.nn.sigmoid(gates[:, 3 * H:4 * H])
        c = f * c + i * g
        h = o * jnp.tanh(c)
        return h, c

    h, c = lax.fori_loop(0, Tc, step, (h_scr[...], c_scr[...]),
                         unroll=min(8, Tc))

    # Persist state for the next time chunk.
    h_scr[...] = h
    c_scr[...] = c

    # Final Linear(H, 1) on the last timestep's hidden state as a VPU/XLU
    # lane reduction (avoids an N=1 MXU pass); f32 math.
    @pl.when(t_blk == n_t - 1)
    def _():
        out_ref[...] = (jnp.sum(h * wfc_ref[...], axis=-1, keepdims=True)
                        + bfc_ref[0, 0])


def lstm_model_forward(x, params, *, block_t=128, block_b=None):
    """x: (B, T, D) float32 (batch-first, like the PyTorch module). -> (B, 1)."""
    wih, whh, b, wfc, bfc = params
    B, T, D = x.shape
    H = whh.shape[0]

    block_t = min(block_t, T)
    block_b = B if block_b is None else min(block_b, B)
    assert T % block_t == 0, "T must be a multiple of block_t"
    assert block_t % 8 == 0 or block_t == T, "block_t must be sublane-aligned"
    assert B % block_b == 0, "B must be a multiple of block_b"
    assert block_b % 8 == 0 or block_b == B, "block_b must be sublane-aligned"
    # TODO(synk): for production sizes pad H to a multiple of 128 so the four
    # gate slices at k*H are lane-tile aligned (free vreg views, no masked loads).

    # bf16 operands for the MXU; biases / fc weight stay f32 (VPU math in f32).
    wih_bf = wih.astype(jnp.bfloat16)
    whh_bf = whh.astype(jnp.bfloat16)

    # Explicit VMEM budget sized to the actual residents (+ headroom); the
    # scoped defaults (16/32 MiB) only cover toy sizes. Capped at v7x's 64 MiB.
    need = (2 * block_b * block_t * D * 4          # x chunk (double-buffered) f32
            + (D * 4 * H + H * 4 * H) * 2          # bf16 weights, single-buffered
            + (4 * H + H + 1) * 4                  # b, w_fc, b_fc
            + block_b * block_t * 4 * H * 4        # pre scratch f32
            + 2 * block_b * H * 4                  # h / c scratch
            + 2 * block_b * 4)                     # out
    vmem_limit = min(max(int(need * 1.5) + (4 << 20), 32 << 20), 64 << 20)

    def _resident(shape):
        # Constant-index resident block: stays in VMEM for the whole grid and
        # is NOT double-buffered (halves resident weight VMEM).
        try:
            return pl.BlockSpec(shape, lambda bb, tt: (0,) * len(shape),
                                pipeline_mode=pl.Buffered(1))
        except TypeError:  # older jax without pipeline_mode on BlockSpec
            return pl.BlockSpec(shape, lambda bb, tt: (0,) * len(shape))

    grid = (B // block_b, T // block_t)
    return pl.pallas_call(
        lstm_kernel,
        out_shape=jax.ShapeDtypeStruct((B, 1), jnp.float32),
        grid_spec=pltpu.PrefetchScalarGridSpec(
            num_scalar_prefetch=0,
            grid=grid,
            in_specs=[
                # streamed time-chunks of x (auto double-buffered DMA)
                pl.BlockSpec((block_b, block_t, D), lambda bb, tt: (bb, tt, 0)),
                # weights / bias resident in VMEM across the grid
                _resident((D, 4 * H)),
                _resident((H, 4 * H)),
                _resident((1, 4 * H)),
                _resident((1, H)),
                # fc bias as an SMEM scalar
                pl.BlockSpec(memory_space=pltpu.MemorySpace.SMEM),
            ],
            out_specs=pl.BlockSpec((block_b, 1), lambda bb, tt: (bb, 0)),
            scratch_shapes=[
                pltpu.VMEM((block_b, H), jnp.float32),               # h state
                pltpu.VMEM((block_b, H), jnp.float32),               # c state
                pltpu.VMEM((block_b, block_t, 4 * H), jnp.float32),  # pre chunk
            ],
        ),
        compiler_params=pltpu.CompilerParams(
            # batch blocks are independent (shards across v7x's 2 TCs);
            # the recurrence is serial in T.
            dimension_semantics=("parallel", "arbitrary"),
            vmem_limit_bytes=vmem_limit),
    )(x, wih_bf, whh_bf, b, wfc, bfc)


def init_params(key, input_dim, hidden_dim):
    """Deterministic init mirroring nn.LSTM / nn.Linear shapes.
    PyTorch stores W_ih (4H, D), W_hh (4H, H); we keep the transposed layout
    so gate matmuls are plain row-major dots. fc weight is stored as (1, H)."""
    H = hidden_dim
    k1, k2, k3, k4, k5, k6 = jax.random.split(key, 6)
    s = 1.0 / jnp.sqrt(H)
    wih = jax.random.uniform(k1, (input_dim, 4 * H), jnp.float32, -s, s)
    whh = jax.random.uniform(k2, (H, 4 * H), jnp.float32, -s, s)
    b_ih = jax.random.uniform(k3, (4 * H,), jnp.float32, -s, s)
    b_hh = jax.random.uniform(k4, (4 * H,), jnp.float32, -s, s)
    b = (b_ih + b_hh).reshape(1, 4 * H)
    wfc = jax.random.uniform(k5, (1, H), jnp.float32, -s, s)
    bfc = jax.random.uniform(k6, (1, 1), jnp.float32, -s, s)
    return wih, whh, b, wfc, bfc


def lstm_reference(x, params):
    """Pure-JAX f32 reference matching PyTorch nn.LSTM(+Linear) semantics."""
    wih, whh, b, wfc, bfc = params
    B, T, D = x.shape
    H = whh.shape[0]
    hp = lax.Precision.HIGHEST
    h = jnp.zeros((B, H), jnp.float32)
    c = jnp.zeros((B, H), jnp.float32)
    for t in range(T):
        gates = (jnp.dot(x[:, t, :], wih, precision=hp)
                 + jnp.dot(h, whh, precision=hp) + b)
        i = jax.nn.sigmoid(gates[:, 0 * H:1 * H])
        f = jax.nn.sigmoid(gates[:, 1 * H:2 * H])
        g = jnp.tanh(gates[:, 2 * H:3 * H])
        o = jax.nn.sigmoid(gates[:, 3 * H:4 * H])
        c = f * c + i * g
        h = o * jnp.tanh(c)
    return jnp.sum(h * wfc, axis=-1, keepdims=True) + bfc[0, 0]


if __name__ == "__main__":
    B, T, D, H = 2, 16, 4, 32
    key = jax.random.PRNGKey(0)
    kx, kp = jax.random.split(key)
    x = jax.random.normal(kx, (B, T, D), jnp.float32)
    params = init_params(kp, D, H)

    # block_t=8 -> 2 time chunks, exercising the h/c carry across grid steps.
    out = lstm_model_forward(x, params, block_t=8, block_b=B)
    jax.block_until_ready(out)
    assert out.shape == (B, 1)

    ref = lstm_reference(x, params)
    # bf16 MXU operands drift slightly from the f32 reference; gate math is f32.
    assert jnp.allclose(out, ref, rtol=5e-2, atol=5e-2), (out, ref)
    print("KERNEL_OK")
</pallas_src>

<mosaic_0001>
module attributes {stable_mosaic.version = 11 : i64} {
  func.func @lstm_kernel(%arg0: i32, %arg1: i32, %arg2: memref<2x8x4xf32, #tpu.memory_space<vmem>>, %arg3: memref<4x128xbf16, #tpu.memory_space<vmem>>, %arg4: memref<32x128xbf16, #tpu.memory_space<vmem>>, %arg5: memref<1x128xf32, #tpu.memory_space<vmem>>, %arg6: memref<1x32xf32, #tpu.memory_space<vmem>>, %arg7: memref<1x1xf32, #tpu.memory_space<smem>>, %arg8: memref<2x1xf32, #tpu.memory_space<vmem>>, %arg9: memref<2x32xf32, #tpu.memory_space<vmem>>, %arg10: memref<2x32xf32, #tpu.memory_space<vmem>>, %arg11: memref<2x8x128xf32, #tpu.memory_space<vmem>>) attributes {dimension_semantics = [#tpu.dimension_semantics<parallel>, #tpu.dimension_semantics<arbitrary>], iteration_bounds = array<i64: 1, 2>, scalar_prefetch = 0 : i64, scratch_operands = 3 : i64, tpu.core_type = #tpu.core_type<tc>, window_params = [{transform_indices = @transform_0, window_bounds = array<i64: 2, 8, 4>}, {pipeline_mode = #tpu.pipeline_mode<synchronous>, transform_indices = @transform_1, window_bounds = array<i64: 4, 128>}, {pipeline_mode = #tpu.pipeline_mode<synchronous>, transform_indices = @transform_2, window_bounds = array<i64: 32, 128>}, {pipeline_mode = #tpu.pipeline_mode<synchronous>, transform_indices = @transform_3, window_bounds = array<i64: 1, 128>}, {pipeline_mode = #tpu.pipeline_mode<synchronous>, transform_indices = @transform_4, window_bounds = array<i64: 1, 32>}, {transform_indices = @transform_5, window_bounds = array<i64: 1, 1>}, {transform_indices = @transform_6, window_bounds = array<i64: 2, 1>}]} {
    %c0_i32 = arith.constant 0 : i32
    %0 = arith.cmpi eq, %arg1, %c0_i32 : i32
    %1 = arith.extui %0 : i1 to i32
    %c0_i32_0 = arith.constant 0 : i32
    %2 = arith.cmpi ne, %1, %c0_i32_0 : i32
    scf.if %2 {
      %cst_71 = arith.constant 0.000000e+00 : f32
      %269 = vector.broadcast %cst_71 : f32 to vector<2x32xf32>
      %c0_72 = arith.constant 0 : index
      %c0_73 = arith.constant 0 : index
      %270 = vector.load %arg9[%c0_72, %c0_73] : memref<2x32xf32, #tpu.memory_space<vmem>>, vector<2x32xf32>
      tpu.vector_store %arg9[%c0_72, %c0_73], %269 {strides = array<i32>} : memref<2x32xf32, #tpu.memory_space<vmem>>, vector<2x32xf32>,
      %cst_74 = arith.constant 0.000000e+00 : f32
      %271 = vector.broadcast %cst_74 : f32 to vector<2x32xf32>
      %c0_75 = arith.constant 0 : index
      %c0_76 = arith.constant 0 : index
      %272 = vector.load %arg10[%c0_75, %c0_76] : memref<2x32xf32, #tpu.memory_space<vmem>>, vector<2x32xf32>
      tpu.vector_store %arg10[%c0_75, %c0_76], %271 {strides = array<i32>} : memref<2x32xf32, #tpu.memory_space<vmem>>, vector<2x32xf32>,
    } else {
    }
    %c0 = arith.constant 0 : index
    %c0_1 = arith.constant 0 : index
    %c0_2 = arith.constant 0 : index
    %3 = vector.load %arg2[%c0, %c0_1, %c0_2] : memref<2x8x4xf32, #tpu.memory_space<vmem>>, vector<2x8x4xf32>
    %4 = vector.shape_cast %3 : vector<2x8x4xf32> to vector<16x4xf32>
    %5 = arith.truncf %4 : vector<16x4xf32> to vector<16x4xbf16>
    %c0_3 = arith.constant 0 : index
    %c0_4 = arith.constant 0 : index
    %6 = vector.load %arg3[%c0_3, %c0_4] : memref<4x128xbf16, #tpu.memory_space<vmem>>, vector<4x128xbf16>
    %cst = arith.constant dense<0.000000e+00> : vector<16x128xf32>
    %7 = tpu.matmul %5, %6, %cst {dimension_numbers = #tpu.dot_dimension_numbers<[1], [0], [0], [1], [0, 0, 1, 1], [], []>} : vector<16x4xbf16>, vector<4x128xbf16>, vector<16x128xf32> -> vector<16x128xf32>
    %c0_5 = arith.constant 0 : index
    %c0_6 = arith.constant 0 : index
    %8 = vector.load %arg5[%c0_5, %c0_6] : memref<1x128xf32, #tpu.memory_space<vmem>>, vector<1x128xf32>
    %9 = vector.broadcast %8 : vector<1x128xf32> to vector<16x128xf32>
    %10 = arith.addf %7, %9 : vector<16x128xf32>
    %11 = vector.shape_cast %10 : vector<16x128xf32> to vector<2x8x128xf32>
    %c0_7 = arith.constant 0 : index
    %c0_8 = arith.constant 0 : index
    %c0_9 = arith.constant 0 : index
    %12 = vector.load %arg11[%c0_7, %c0_8, %c0_9] : memref<2x8x128xf32, #tpu.memory_space<vmem>>, vector<2x8x128xf32>
    tpu.vector_store %arg11[%c0_7, %c0_8, %c0_9], %11 {strides = array<i32>} : memref<2x8x128xf32, #tpu.memory_space<vmem>>, vector<2x8x128xf32>,
    %c0_10 = arith.constant 0 : index
    %c0_11 = arith.constant 0 : index
    %13 = vector.load %arg4[%c0_10, %c0_11] : memref<32x128xbf16, #tpu.memory_space<vmem>>, vector<32x128xbf16>
    %c0_12 = arith.constant 0 : index
    %c0_13 = arith.constant 0 : index
    %14 = vector.load %arg9[%c0_12, %c0_13] : memref<2x32xf32, #tpu.memory_space<vmem>>, vector<2x32xf32>
    %c0_14 = arith.constant 0 : index
    %c0_15 = arith.constant 0 : index
    %15 = vector.load %arg10[%c0_14, %c0_15] : memref<2x32xf32, #tpu.memory_space<vmem>>, vector<2x32xf32>
    %c0_i32_16 = arith.constant 0 : i32
    %c0_17 = arith.constant 0 : index
    %16 = arith.index_cast %c0_i32_16 : i32 to index
    %c0_18 = arith.constant 0 : index
    %17 = vector.load %arg11[%c0_17, %16, %c0_18] : memref<2x8x128xf32, #tpu.memory_space<vmem>>, vector<2x1x128xf32>
    %18 = vector.shape_cast %17 : vector<2x1x128xf32> to vector<2x128xf32>
    %19 = arith.truncf %14 : vector<2x32xf32> to vector<2x32xbf16>
    %cst_19 = arith.constant dense<0.000000e+00> : vector<2x128xf32>
    %20 = tpu.matmul %19, %13, %cst_19 {dimension_numbers = #tpu.dot_dimension_numbers<[1], [0], [0], [1], [0, 0, 1, 1], [], []>} : vector<2x32xbf16>, vector<32x128xbf16>, vector<2x128xf32> -> vector<2x128xf32>
    %21 = arith.addf %20, %18 : vector<2x128xf32>
    %22 = vector.extract_strided_slice %21 {offsets = [0, 0], sizes = [2, 32], strides = [1, 1]} : vector<2x128xf32> to vector<2x32xf32>
    %23 = arith.negf %22 : vector<2x32xf32>
    %24 = math.exp %23 : vector<2x32xf32>
    %cst_20 = arith.constant 1.000000e+00 : f32
    %25 = vector.broadcast %cst_20 : f32 to vector<2x32xf32>
    %26 = arith.addf %25, %24 : vector<2x32xf32>
    %27 = arith.divf %25, %26 : vector<2x32xf32>
    %28 = vector.extract_strided_slice %21 {offsets = [0, 32], sizes = [2, 32], strides = [1, 1]} : vector<2x128xf32> to vector<2x32xf32>
    %29 = arith.negf %28 : vector<2x32xf32>
    %30 = math.exp %29 : vector<2x32xf32>
    %cst_21 = arith.constant 1.000000e+00 : f32
    %31 = vector.broadcast %cst_21 : f32 to vector<2x32xf32>
    %32 = arith.addf %31, %30 : vector<2x32xf32>
    %33 = arith.divf %31, %32 : vector<2x32xf32>
    %34 = vector.extract_strided_slice %21 {offsets = [0, 64], sizes = [2, 32], strides = [1, 1]} : vector<2x128xf32> to vector<2x32xf32>
    %35 = math.tanh %34 : vector<2x32xf32>
    %36 = vector.extract_strided_slice %21 {offsets = [0, 96], sizes = [2, 32], strides = [1, 1]} : vector<2x128xf32> to vector<2x32xf32>
    %37 = arith.negf %36 : vector<2x32xf32>
    %38 = math.exp %37 : vector<2x32xf32>
    %cst_22 = arith.constant 1.000000e+00 : f32
    %39 = vector.broadcast %cst_22 : f32 to vector<2x32xf32>
    %40 = arith.addf %39, %38 : vector<2x32xf32>
    %41 = arith.divf %39, %40 : vector<2x32xf32>
    %42 = arith.mulf %33, %15 : vector<2x32xf32>
    %43 = arith.mulf %27, %35 : vector<2x32xf32>
    %44 = arith.addf %42, %43 : vector<2x32xf32>
    %45 = math.tanh %44 : vector<2x32xf32>
    %46 = arith.mulf %41, %45 : vector<2x32xf32>
    %c1_i32 = arith.constant 1 : i32
    %c0_23 = arith.constant 0 : index
    %47 = arith.index_cast %c1_i32 : i32 to index
    %c0_24 = arith.constant 0 : index
    %48 = vector.load %arg11[%c0_23, %47, %c0_24] : memref<2x8x128xf32, #tpu.memory_space<vmem>>, vector<2x1x128xf32>
    %49 = vector.shape_cast %48 : vector<2x1x128xf32> to vector<2x128xf32>
    %50 = arith.truncf %46 : vector<2x32xf32> to vector<2x32xbf16>
    %cst_25 = arith.constant dense<0.000000e+00> : vector<2x128xf32>
    %51 = tpu.matmul %50, %13, %cst_25 {dimension_numbers = #tpu.dot_dimension_numbers<[1], [0], [0], [1], [0, 0, 1, 1], [], []>} : vector<2x32xbf16>, vector<32x128xbf16>, vector<2x128xf32> -> vector<2x128xf32>
    %52 = arith.addf %51, %49 : vector<2x128xf32>
    %53 = vector.extract_strided_slice %52 {offsets = [0, 0], sizes = [2, 32], strides = [1, 1]} : vector<2x128xf32> to vector<2x32xf32>
    %54 = arith.negf %53 : vector<2x32xf32>
    %55 = math.exp %54 : vector<2x32xf32>
    %cst_26 = arith.constant 1.000000e+00 : f32
    %56 = vector.broadcast %cst_26 : f32 to vector<2x32xf32>
    %57 = arith.addf %56, %55 : vector<2x32xf32>
    %58 = arith.divf %56, %57 : vector<2x32xf32>
    %59 = vector.extract_strided_slice %52 {offsets = [0, 32], sizes = [2, 32], strides = [1, 1]} : vector<2x128xf32> to vector<2x32xf32>
    %60 = arith.negf %59 : vector<2x32xf32>
    %61 = math.exp %60 : vector<2x32xf32>
    %cst_27 = arith.constant 1.000000e+00 : f32
    %62 = vector.broadcast %cst_27 : f32 to vector<2x32xf32>
    %63 = arith.addf %62, %61 : vector<2x32xf32>
    %64 = arith.divf %62, %63 : vector<2x32xf32>
    %65 = vector.extract_strided_slice %52 {offsets = [0, 64], sizes = [2, 32], strides = [1, 1]} : vector<2x128xf32> to vector<2x32xf32>
    %66 = math.tanh %65 : vector<2x32xf32>
    %67 = vector.extract_strided_slice %52 {offsets = [0, 96], sizes = [2, 32], strides = [1, 1]} : vector<2x128xf32> to vector<2x32xf32>
    %68 = arith.negf %67 : vector<2x32xf32>
    %69 = math.exp %68 : vector<2x32xf32>
    %cst_28 = arith.constant 1.000000e+00 : f32
    %70 = vector.broadcast %cst_28 : f32 to vector<2x32xf32>
    %71 = arith.addf %70, %69 : vector<2x32xf32>
    %72 = arith.divf %70, %71 : vector<2x32xf32>
    %73 = arith.mulf %64, %44 : vector<2x32xf32>
    %74 = arith.mulf %58, %66 : vector<2x32xf32>
    %75 = arith.addf %73, %74 : vector<2x32xf32>
    %76 = math.tanh %75 : vector<2x32xf32>
    %77 = arith.mulf %72, %76 : vector<2x32xf32>
    %c2_i32 = arith.constant 2 : i32
    %c0_29 = arith.constant 0 : index
    %78 = arith.index_cast %c2_i32 : i32 to index
    %c0_30 = arith.constant 0 : index
    %79 = vector.load %arg11[%c0_29, %78, %c0_30] : memref<2x8x128xf32, #tpu.memory_space<vmem>>, vector<2x1x128xf32>
    %80 = vector.shape_cast %79 : vector<2x1x128xf32> to vector<2x128xf32>
    %81 = arith.truncf %77 : vector<2x32xf32> to vector<2x32xbf16>
    %cst_31 = arith.constant dense<0.000000e+00> : vector<2x128xf32>
    %82 = tpu.matmul %81, %13, %cst_31 {dimension_numbers = #tpu.dot_dimension_numbers<[1], [0], [0], [1], [0, 0, 1, 1], [], []>} : vector<2x32xbf16>, vector<32x128xbf16>, vector<2x128xf32> -> vector<2x128xf32>
    %83 = arith.addf %82, %80 : vector<2x128xf32>
    %84 = vector.extract_strided_slice %83 {offsets = [0, 0], sizes = [2, 32], strides = [1, 1]} : vector<2x128xf32> to vector<2x32xf32>
    %85 = arith.negf %84 : vector<2x32xf32>
    %86 = math.exp %85 : vector<2x32xf32>
    %cst_32 = arith.constant 1.000000e+00 : f32
    %87 = vector.broadcast %cst_32 : f32 to vector<2x32xf32>
    %88 = arith.addf %87, %86 : vector<2x32xf32>
    %89 = arith.divf %87, %88 : vector<2x32xf32>
    %90 = vector.extract_strided_slice %83 {offsets = [0, 32], sizes = [2, 32], strides = [1, 1]} : vector<2x128xf32> to vector<2x32xf32>
    %91 = arith.negf %90 : vector<2x32xf32>
    %92 = math.exp %91 : vector<2x32xf32>
    %cst_33 = arith.constant 1.000000e+00 : f32
    %93 = vector.broadcast %cst_33 : f32 to vector<2x32xf32>
    %94 = arith.addf %93, %92 : vector<2x32xf32>
    %95 = arith.divf %93, %94 : vector<2x32xf32>
    %96 = vector.extract_strided_slice %83 {offsets = [0, 64], sizes = [2, 32], strides = [1, 1]} : vector<2x128xf32> to vector<2x32xf32>
    %97 = math.tanh %96 : vector<2x32xf32>
    %98 = vector.extract_strided_slice %83 {offsets = [0, 96], sizes = [2, 32], strides = [1, 1]} : vector<2x128xf32> to vector<2x32xf32>
    %99 = arith.negf %98 : vector<2x32xf32>
    %100 = math.exp %99 : vector<2x32xf32>
    %cst_34 = arith.constant 1.000000e+00 : f32
    %101 = vector.broadcast %cst_34 : f32 to vector<2x32xf32>
    %102 = arith.addf %101, %100 : vector<2x32xf32>
    %103 = arith.divf %101, %102 : vector<2x32xf32>
    %104 = arith.mulf %95, %75 : vector<2x32xf32>
    %105 = arith.mulf %89, %97 : vector<2x32xf32>
    %106 = arith.addf %104, %105 : vector<2x32xf32>
    %107 = math.tanh %106 : vector<2x32xf32>
    %108 = arith.mulf %103, %107 : vector<2x32xf32>
    %c3_i32 = arith.constant 3 : i32
    %c0_35 = arith.constant 0 : index
    %109 = arith.index_cast %c3_i32 : i32 to index
    %c0_36 = arith.constant 0 : index
    %110 = vector.load %arg11[%c0_35, %109, %c0_36] : memref<2x8x128xf32, #tpu.memory_space<vmem>>, vector<2x1x128xf32>
    %111 = vector.shape_cast %110 : vector<2x1x128xf32> to vector<2x128xf32>
    %112 = arith.truncf %108 : vector<2x32xf32> to vector<2x32xbf16>
    %cst_37 = arith.constant dense<0.000000e+00> : vector<2x128xf32>
    %113 = tpu.matmul %112, %13, %cst_37 {dimension_numbers = #tpu.dot_dimension_numbers<[1], [0], [0], [1], [0, 0, 1, 1], [], []>} : vector<2x32xbf16>, vector<32x128xbf16>, vector<2x128xf32> -> vector<2x128xf32>
    %114 = arith.addf %113, %111 : vector<2x128xf32>
    %115 = vector.extract_strided_slice %114 {offsets = [0, 0], sizes = [2, 32], strides = [1, 1]} : vector<2x128xf32> to vector<2x32xf32>
    %116 = arith.negf %115 : vector<2x32xf32>
    %117 = math.exp %116 : vector<2x32xf32>
    %cst_38 = arith.constant 1.000000e+00 : f32
    %118 = vector.broadcast %cst_38 : f32 to vector<2x32xf32>
    %119 = arith.addf %118, %117 : vector<2x32xf32>
    %120 = arith.divf %118, %119 : vector<2x32xf32>
    %121 = vector.extract_strided_slice %114 {offsets = [0, 32], sizes = [2, 32], strides = [1, 1]} : vector<2x128xf32> to vector<2x32xf32>
    %122 = arith.negf %121 : vector<2x32xf32>
    %123 = math.exp %122 : vector<2x32xf32>
    %cst_39 = arith.constant 1.000000e+00 : f32
    %124 = vector.broadcast %cst_39 : f32 to vector<2x32xf32>
    %125 = arith.addf %124, %123 : vector<2x32xf32>
    %126 = arith.divf %124, %125 : vector<2x32xf32>
    %127 = vector.extract_strided_slice %114 {offsets = [0, 64], sizes = [2, 32], strides = [1, 1]} : vector<2x128xf32> to vector<2x32xf32>
    %128 = math.tanh %127 : vector<2x32xf32>
    %129 = vector.extract_strided_slice %114 {offsets = [0, 96], sizes = [2, 32], strides = [1, 1]} : vector<2x128xf32> to vector<2x32xf32>
    %130 = arith.negf %129 : vector<2x32xf32>
    %131 = math.exp %130 : vector<2x32xf32>
    %cst_40 = arith.constant 1.000000e+00 : f32
    %132 = vector.broadcast %cst_40 : f32 to vector<2x32xf32>
    %133 = arith.addf %132, %131 : vector<2x32xf32>
    %134 = arith.divf %132, %133 : vector<2x32xf32>
    %135 = arith.mulf %126, %106 : vector<2x32xf32>
    %136 = arith.mulf %120, %128 : vector<2x32xf32>
    %137 = arith.addf %135, %136 : vector<2x32xf32>
    %138 = math.tanh %137 : vector<2x32xf32>
    %139 = arith.mulf %134, %138 : vector<2x32xf32>
    %c4_i32 = arith.constant 4 : i32
    %c0_41 = arith.constant 0 : index
    %140 = arith.index_cast %c4_i32 : i32 to index
    %c0_42 = arith.constant 0 : index
    %141 = vector.load %arg11[%c0_41, %140, %c0_42] : memref<2x8x128xf32, #tpu.memory_space<vmem>>, vector<2x1x128xf32>
    %142 = vector.shape_cast %141 : vector<2x1x128xf32> to vector<2x128xf32>
    %143 = arith.truncf %139 : vector<2x32xf32> to vector<2x32xbf16>
    %cst_43 = arith.constant dense<0.000000e+00> : vector<2x128xf32>
    %144 = tpu.matmul %143, %13, %cst_43 {dimension_numbers = #tpu.dot_dimension_numbers<[1], [0], [0], [1], [0, 0, 1, 1], [], []>} : vector<2x32xbf16>, vector<32x128xbf16>, vector<2x128xf32> -> vector<2x128xf32>
    %145 = arith.addf %144, %142 : vector<2x128xf32>
    %146 = vector.extract_strided_slice %145 {offsets = [0, 0], sizes = [2, 32], strides = [1, 1]} : vector<2x128xf32> to vector<2x32xf32>
    %147 = arith.negf %146 : vector<2x32xf32>
    %148 = math.exp %147 : vector<2x32xf32>
    %cst_44 = arith.constant 1.000000e+00 : f32
    %149 = vector.broadcast %cst_44 : f32 to vector<2x32xf32>
    %150 = arith.addf %149, %148 : vector<2x32xf32>
    %151 = arith.divf %149, %150 : vector<2x32xf32>
    %152 = vector.extract_strided_slice %145 {offsets = [0, 32], sizes = [2, 32], strides = [1, 1]} : vector<2x128xf32> to vector<2x32xf32>
    %153 = arith.negf %152 : vector<2x32xf32>
    %154 = math.exp %153 : vector<2x32xf32>
    %cst_45 = arith.constant 1.000000e+00 : f32
    %155 = vector.broadcast %cst_45 : f32 to vector<2x32xf32>
    %156 = arith.addf %155, %154 : vector<2x32xf32>
    %157 = arith.divf %155, %156 : vector<2x32xf32>
    %158 = vector.extract_strided_slice %145 {offsets = [0, 64], sizes = [2, 32], strides = [1, 1]} : vector<2x128xf32> to vector<2x32xf32>
    %159 = math.tanh %158 : vector<2x32xf32>
    %160 = vector.extract_strided_slice %145 {offsets = [0, 96], sizes = [2, 32], strides = [1, 1]} : vector<2x128xf32> to vector<2x32xf32>
    %161 = arith.negf %160 : vector<2x32xf32>
    %162 = math.exp %161 : vector<2x32xf32>
    %cst_46 = arith.constant 1.000000e+00 : f32
    %163 = vector.broadcast %cst_46 : f32 to vector<2x32xf32>
    %164 = arith.addf %163, %162 : vector<2x32xf32>
    %165 = arith.divf %163, %164 : vector<2x32xf32>
    %166 = arith.mulf %157, %137 : vector<2x32xf32>
    %167 = arith.mulf %151, %159 : vector<2x32xf32>
    %168 = arith.addf %166, %167 : vector<2x32xf32>
    %169 = math.tanh %168 : vector<2x32xf32>
    %170 = arith.mulf %165, %169 : vector<2x32xf32>
    %c5_i32 = arith.constant 5 : i32
    %c0_47 = arith.constant 0 : index
    %171 = arith.index_cast %c5_i32 : i32 to index
    %c0_48 = arith.constant 0 : index
    %172 = vector.load %arg11[%c0_47, %171, %c0_48] : memref<2x8x128xf32, #tpu.memory_space<vmem>>, vector<2x1x128xf32>
    %173 = vector.shape_cast %172 : vector<2x1x128xf32> to vector<2x128xf32>
    %174 = arith.truncf %170 : vector<2x32xf32> to vector<2x32xbf16>
    %cst_49 = arith.constant dense<0.000000e+00> : vector<2x128xf32>
    %175 = tpu.matmul %174, %13, %cst_49 {dimension_numbers = #tpu.dot_dimension_numbers<[1], [0], [0], [1], [0, 0, 1, 1], [], []>} : vector<2x32xbf16>, vector<32x128xbf16>, vector<2x128xf32> -> vector<2x128xf32>
    %176 = arith.addf %175, %173 : vector<2x128xf32>
    %177 = vector.extract_strided_slice %176 {offsets = [0, 0], sizes = [2, 32], strides = [1, 1]} : vector<2x128xf32> to vector<2x32xf32>
    %178 = arith.negf %177 : vector<2x32xf32>
    %179 = math.exp %178 : vector<2x32xf32>
    %cst_50 = arith.constant 1.000000e+00 : f32
    %180 = vector.broadcast %cst_50 : f32 to vector<2x32xf32>
    %181 = arith.addf %180, %179 : vector<2x32xf32>
    %182 = arith.divf %180, %181 : vector<2x32xf32>
    %183 = vector.extract_strided_slice %176 {offsets = [0, 32], sizes = [2, 32], strides = [1, 1]} : vector<2x128xf32> to vector<2x32xf32>
    %184 = arith.negf %183 : vector<2x32xf32>
    %185 = math.exp %184 : vector<2x32xf32>
    %cst_51 = arith.constant 1.000000e+00 : f32
    %186 = vector.broadcast %cst_51 : f32 to vector<2x32xf32>
    %187 = arith.addf %186, %185 : vector<2x32xf32>
    %188 = arith.divf %186, %187 : vector<2x32xf32>
    %189 = vector.extract_strided_slice %176 {offsets = [0, 64], sizes = [2, 32], strides = [1, 1]} : vector<2x128xf32> to vector<2x32xf32>
    %190 = math.tanh %189 : vector<2x32xf32>
    %191 = vector.extract_strided_slice %176 {offsets = [0, 96], sizes = [2, 32], strides = [1, 1]} : vector<2x128xf32> to vector<2x32xf32>
    %192 = arith.negf %191 : vector<2x32xf32>
    %193 = math.exp %192 : vector<2x32xf32>
    %cst_52 = arith.constant 1.000000e+00 : f32
    %194 = vector.broadcast %cst_52 : f32 to vector<2x32xf32>
    %195 = arith.addf %194, %193 : vector<2x32xf32>
    %196 = arith.divf %194, %195 : vector<2x32xf32>
    %197 = arith.mulf %188, %168 : vector<2x32xf32>
    %198 = arith.mulf %182, %190 : vector<2x32xf32>
    %199 = arith.addf %197, %198 : vector<2x32xf32>
    %200 = math.tanh %199 : vector<2x32xf32>
    %201 = arith.mulf %196, %200 : vector<2x32xf32>
    %c6_i32 = arith.constant 6 : i32
    %c0_53 = arith.constant 0 : index
    %202 = arith.index_cast %c6_i32 : i32 to index
    %c0_54 = arith.constant 0 : index
    %203 = vector.load %arg11[%c0_53, %202, %c0_54] : memref<2x8x128xf32, #tpu.memory_space<vmem>>, vector<2x1x128xf32>
    %204 = vector.shape_cast %203 : vector<2x1x128xf32> to vector<2x128xf32>
    %205 = arith.truncf %201 : vector<2x32xf32> to vector<2x32xbf16>
    %cst_55 = arith.constant dense<0.000000e+00> : vector<2x128xf32>
    %206 = tpu.matmul %205, %13, %cst_55 {dimension_numbers = #tpu.dot_dimension_numbers<[1], [0], [0], [1], [0, 0, 1, 1], [], []>} : vector<2x32xbf16>, vector<32x128xbf16>, vector<2x128xf32> -> vector<2x128xf32>
    %207 = arith.addf %206, %204 : vector<2x128xf32>
    %208 = vector.extract_strided_slice %207 {offsets = [0, 0], sizes = [2, 32], strides = [1, 1]} : vector<2x128xf32> to vector<2x32xf32>
    %209 = arith.negf %208 : vector<2x32xf32>
    %210 = math.exp %209 : vector<2x32xf32>
    %cst_56 = arith.constant 1.000000e+00 : f32
    %211 = vector.broadcast %cst_56 : f32 to vector<2x32xf32>
    %212 = arith.addf %211, %210 : vector<2x32xf32>
    %213 = arith.divf %211, %212 : vector<2x32xf32>
    %214 = vector.extract_strided_slice %207 {offsets = [0, 32], sizes = [2, 32], strides = [1, 1]} : vector<2x128xf32> to vector<2x32xf32>
    %215 = arith.negf %214 : vector<2x32xf32>
    %216 = math.exp %215 : vector<2x32xf32>
    %cst_57 = arith.constant 1.000000e+00 : f32
    %217 = vector.broadcast %cst_57 : f32 to vector<2x32xf32>
    %218 = arith.addf %217, %216 : vector<2x32xf32>
    %219 = arith.divf %217, %218 : vector<2x32xf32>
    %220 = vector.extract_strided_slice %207 {offsets = [0, 64], sizes = [2, 32], strides = [1, 1]} : vector<2x128xf32> to vector<2x32xf32>
    %221 = math.tanh %220 : vector<2x32xf32>
    %222 = vector.extract_strided_slice %207 {offsets = [0, 96], sizes = [2, 32], strides = [1, 1]} : vector<2x128xf32> to vector<2x32xf32>
    %223 = arith.negf %222 : vector<2x32xf32>
    %224 = math.exp %223 : vector<2x32xf32>
    %cst_58 = arith.constant 1.000000e+00 : f32
    %225 = vector.broadcast %cst_58 : f32 to vector<2x32xf32>
    %226 = arith.addf %225, %224 : vector<2x32xf32>
    %227 = arith.divf %225, %226 : vector<2x32xf32>
    %228 = arith.mulf %219, %199 : vector<2x32xf32>
    %229 = arith.mulf %213, %221 : vector<2x32xf32>
    %230 = arith.addf %228, %229 : vector<2x32xf32>
    %231 = math.tanh %230 : vector<2x32xf32>
    %232 = arith.mulf %227, %231 : vector<2x32xf32>
    %c7_i32 = arith.constant 7 : i32
    %c0_59 = arith.constant 0 : index
    %233 = arith.index_cast %c7_i32 : i32 to index
    %c0_60 = arith.constant 0 : index
    %234 = vector.load %arg11[%c0_59, %233, %c0_60] : memref<2x8x128xf32, #tpu.memory_space<vmem>>, vector<2x1x128xf32>
    %235 = vector.shape_cast %234 : vector<2x1x128xf32> to vector<2x128xf32>
    %236 = arith.truncf %232 : vector<2x32xf32> to vector<2x32xbf16>
    %cst_61 = arith.constant dense<0.000000e+00> : vector<2x128xf32>
    %237 = tpu.matmul %236, %13, %cst_61 {dimension_numbers = #tpu.dot_dimension_numbers<[1], [0], [0], [1], [0, 0, 1, 1], [], []>} : vector<2x32xbf16>, vector<32x128xbf16>, vector<2x128xf32> -> vector<2x128xf32>
    %238 = arith.addf %237, %235 : vector<2x128xf32>
    %239 = vector.extract_strided_slice %238 {offsets = [0, 0], sizes = [2, 32], strides = [1, 1]} : vector<2x128xf32> to vector<2x32xf32>
    %240 = arith.negf %239 : vector<2x32xf32>
    %241 = math.exp %240 : vector<2x32xf32>
    %cst_62 = arith.constant 1.000000e+00 : f32
    %242 = vector.broadcast %cst_62 : f32 to vector<2x32xf32>
    %243 = arith.addf %242, %241 : vector<2x32xf32>
    %244 = arith.divf %242, %243 : vector<2x32xf32>
    %245 = vector.extract_strided_slice %238 {offsets = [0, 32], sizes = [2, 32], strides = [1, 1]} : vector<2x128xf32> to vector<2x32xf32>
    %246 = arith.negf %245 : vector<2x32xf32>
    %247 = math.exp %246 : vector<2x32xf32>
    %cst_63 = arith.constant 1.000000e+00 : f32
    %248 = vector.broadcast %cst_63 : f32 to vector<2x32xf32>
    %249 = arith.addf %248, %247 : vector<2x32xf32>
    %250 = arith.divf %248, %249 : vector<2x32xf32>
    %251 = vector.extract_strided_slice %238 {offsets = [0, 64], sizes = [2, 32], strides = [1, 1]} : vector<2x128xf32> to vector<2x32xf32>
    %252 = math.tanh %251 : vector<2x32xf32>
    %253 = vector.extract_strided_slice %238 {offsets = [0, 96], sizes = [2, 32], strides = [1, 1]} : vector<2x128xf32> to vector<2x32xf32>
    %254 = arith.negf %253 : vector<2x32xf32>
    %255 = math.exp %254 : vector<2x32xf32>
    %cst_64 = arith.constant 1.000000e+00 : f32
    %256 = vector.broadcast %cst_64 : f32 to vector<2x32xf32>
    %257 = arith.addf %256, %255 : vector<2x32xf32>
    %258 = arith.divf %256, %257 : vector<2x32xf32>
    %259 = arith.mulf %250, %230 : vector<2x32xf32>
    %260 = arith.mulf %244, %252 : vector<2x32xf32>
    %261 = arith.addf %259, %260 : vector<2x32xf32>
    %262 = math.tanh %261 : vector<2x32xf32>
    %263 = arith.mulf %258, %262 : vector<2x32xf32>
    %c8_i32 = arith.constant 8 : i32
    %c0_65 = arith.constant 0 : index
    %c0_66 = arith.constant 0 : index
    %264 = vector.load %arg9[%c0_65, %c0_66] : memref<2x32xf32, #tpu.memory_space<vmem>>, vector<2x32xf32>
    tpu.vector_store %arg9[%c0_65, %c0_66], %263 {strides = array<i32>} : memref<2x32xf32, #tpu.memory_space<vmem>>, vector<2x32xf32>,
    %c0_67 = arith.constant 0 : index
    %c0_68 = arith.constant 0 : index
    %265 = vector.load %arg10[%c0_67, %c0_68] : memref<2x32xf32, #tpu.memory_space<vmem>>, vector<2x32xf32>
    tpu.vector_store %arg10[%c0_67, %c0_68], %261 {strides = array<i32>} : memref<2x32xf32, #tpu.memory_space<vmem>>, vector<2x32xf32>,
    %c1_i32_69 = arith.constant 1 : i32
    %266 = arith.cmpi eq, %arg1, %c1_i32_69 : i32
    %267 = arith.extui %266 : i1 to i32
    %c0_i32_70 = arith.constant 0 : i32
    %268 = arith.cmpi ne, %267, %c0_i32_70 : i32
    scf.if %268 {
      %c0_71 = arith.constant 0 : index
      %c0_72 = arith.constant 0 : index
      %269 = vector.load %arg6[%c0_71, %c0_72] : memref<1x32xf32, #tpu.memory_space<vmem>>, vector<1x32xf32>
      %270 = vector.broadcast %269 : vector<1x32xf32> to vector<2x32xf32>
      %271 = arith.mulf %263, %270 : vector<2x32xf32>
      %cst_73 = arith.constant dense<0.000000e+00> : vector<2xf32>
      %272 = vector.multi_reduction <add>, %271, %cst_73 [1] : vector<2x32xf32> to vector<2xf32>
      %273 = vector.shape_cast %272 : vector<2xf32> to vector<2x1xf32>
      %c0_74 = arith.constant 0 : index
      %c0_75 = arith.constant 0 : index
      %274 = memref.load %arg7[%c0_74, %c0_75] : memref<1x1xf32, #tpu.memory_space<smem>>
      %275 = vector.broadcast %274 : f32 to vector<2x1xf32>
      %276 = arith.addf %273, %275 : vector<2x1xf32>
      %c0_76 = arith.constant 0 : index
      %c0_77 = arith.constant 0 : index
      %277 = vector.load %arg8[%c0_76, %c0_77] : memref<2x1xf32, #tpu.memory_space<vmem>>, vector<2x1xf32>
      tpu.vector_store %arg8[%c0_76, %c0_77], %276 {strides = array<i32>} : memref<2x1xf32, #tpu.memory_space<vmem>>, vector<2x1xf32>,
    } else {
    }
    return
  }
  func.func @transform_0(%arg0: i32, %arg1: i32) -> (i32, i32, i32) {
    %c0_i32 = arith.constant 0 : i32
    %c0_i32_0 = arith.constant 0 : i32
    return %arg0, %arg1, %c0_i32 : i32, i32, i32
  }
  func.func @transform_1(%arg0: i32, %arg1: i32) -> (i32, i32) {
    %c0_i32 = arith.constant 0 : i32
    %c0_i32_0 = arith.constant 0 : i32
    %c0_i32_1 = arith.constant 0 : i32
    return %c0_i32, %c0_i32_0 : i32, i32
  }
  func.func @transform_2(%arg0: i32, %arg1: i32) -> (i32, i32) {
    %c0_i32 = arith.constant 0 : i32
    %c0_i32_0 = arith.constant 0 : i32
    %c0_i32_1 = arith.constant 0 : i32
    return %c0_i32, %c0_i32_0 : i32, i32
  }
  func.func @transform_3(%arg0: i32, %arg1: i32) -> (i32, i32) {
    %c0_i32 = arith.constant 0 : i32
    %c0_i32_0 = arith.constant 0 : i32
    %c0_i32_1 = arith.constant 0 : i32
    return %c0_i32, %c0_i32_0 : i32, i32
  }
  func.func @transform_4(%arg0: i32, %arg1: i32) -> (i32, i32) {
    %c0_i32 = arith.constant 0 : i32
    %c0_i32_0 = arith.constant 0 : i32
    %c0_i32_1 = arith.constant 0 : i32
    return %c0_i32, %c0_i32_0 : i32, i32
  }
  func.func @transform_5(%arg0: i32, %arg1: i32) -> (i32, i32) {
    %c0_i32 = arith.constant 0 : i32
    %c0_i32_0 = arith.constant 0 : i32
    %c0_i32_1 = arith.constant 0 : i32
    return %c0_i32, %c0_i32_0 : i32, i32
  }
  func.func @transform_6(%arg0: i32, %arg1: i32) -> (i32, i32) {
    %c0_i32 = arith.constant 0 : i32
    %c0_i32_0 = arith.constant 0 : i32
    return %arg0, %c0_i32 : i32, i32
  }
}

</mosaic_0001>

<bundles_post_ra>
// kernel: tpu_custom_call.1
= control target key start
LH: loop header
LB: loop body
LE: loop exit
PB: predicated region body
PF: predicated region fallthrough
CT: control target
= control target key end

     0   :  { %s1350_s0 = inlined_call_operand.vmem [shape: f32[2,16,4], index: 0, kind: input, shape index: {}]   ;;  %s1351_s1 = inlined_call_operand.vmem [shape: bf16[4,128], index: 1, kind: input, shape index: {}]   ;;  %s1352_s2 = inlined_call_operand.vmem [shape: bf16[32,128], index: 2, kind: input, shape index: {}]   ;;  %s1353_s3 = inlined_call_operand.vmem [shape: f32[1,128], index: 3, kind: input, shape index: {}]   ;;  %s1354_s4 = inlined_call_operand.vmem [shape: f32[1,32], index: 4, kind: input, shape index: {}]   ;;  %s1355_s5 = inlined_call_operand.<no memory space> [shape: f32[1,1], index: 5, kind: input, shape index: {}]   ;;  %s1356_s6 = inlined_call_operand.vmem [shape: f32[2,1], index: 6, kind: output, shape index: {}]  }
   0x1   :  { %11 = sst [smem:[#allocation5]] %s1355_s5 }
   0x2   :  { %s1217_s23 = smov 0   ;;  %s1219_s24 = smov 0  }
   0x3   :  { %s1221_s25 = smov 0   ;;  %s1223_s26 = smov 0  }
   0x4   :  { %s1225_s27 = smov 0  }
   0x5 LB: > { %s26_s5 = sadd.s32 1, %s1167_s26  ;;  %p45_p1 = scmp.ne.s32.totalorder %s1159_s24, %s1155_s23  ;;  %s1171_s27 = sphi %s1225_s27, %s17_s27   ;;  %s1167_s26 = sphi %s1223_s26, %s1360_s26   ;;  %s1163_s25 = sphi %s1221_s25, %s1359_s25   ;;  %s1159_s24 = sphi %s1219_s24, %s1358_s24   ;;  %s1155_s23 = sphi %s1217_s23, %s1357_s23  }
   0x6   : > { %p27_p0 = scmp.ge.s32.totalorder %s26_s5, 2  ;;  %p46_p2 = scmp.eq.s32.totalorder %s1171_s27, 0 }
   0x7   : > { %s38_s29 = sadd.s32 1, %s1159_s24  ;;  %p984_p5 = scmp.ge.s32.totalorder %s1171_s27, 2 }
   0x8   : > { %s1362_s5 = smov (%p27_p0, %s26_s5), 0  ;;  %p47_p3 = por %p46_p2, %p45_p1 }
   0x9   : > { %s34_s28 = ssub.s32 %s1167_s26, %s1362_s5  ;;  %217 = sbr.rel (%p984_p5) target bundleno = 20 (0x14), region = 36 }
   0xa   : > { %p36_p4 = scmp.eq.s32.totalorder %s34_s28, 0 }
   0xc   : > { %s1252_s30 = scalar_select %p36_p4, %s1159_s24, %s38_s29  }
   0xe   : > { %220 = sbr.rel (!%p47_p3) target bundleno = 20 (0x14), region = 40  ;;  %s222_s7 = sand.u32 (%p47_p3), 1, %s1159_s24  }
   0xf   : > { %s986_s8 = sshll.u32 (%p47_p3), %s1167_s26, 3  ;;  %s985_s9 = sshll.u32 (%p47_p3), %s222_s7, 4 }
  0x10   : > { %s229_s12 = scalar_lea.vmem (%p47_p3), %s1350_s0, %s986_s8  ;;  %s224_s13 = scalar_lea.vmem (%p47_p3), [#allocation6], %s985_s9 }
  0x11   : > { %v260_v0 = vld [vmem:[%s229_s12] sm:$0xff] (%p47_p3)  ;;  %v262_v1 = vld [vmem:[%s229_s12 + $0x10] sm:$0xff] (%p47_p3) }
  0x12   : > { %261 = vst [vmem:[%s224_s13] sm:$0xff] (%p47_p3), %v260_v0 }
  0x13   : > { %263 = vst [vmem:[%s224_s13 + $0x8] sm:$0xff] %v262_v1 }
  0x14 PF: > { %p987_p6 = scmp.ge.s32.totalorder %s1171_s27, 1  ;;  %p268_p7 = scmp.lt.s32.totalorder %s1171_s27, 3 }
  0x16   : > { %p269_p8 = pnand %p987_p6, %p268_p7 }
  0x17   : > { %s275_s14 = sand.u32 (!%p269_p8), 1, %s1155_s23   ;;  %p989_p9 = scmp.ne.s32.totalorder (!%p269_p8), %s1163_s25, 0 }
  0x18   : > { %272 = sbr.rel (%p269_p8) target bundleno = 5055 (0x13bf), region = 78  ;;  %s988_s15 = sshll.u32 (!%p269_p8), %s275_s14, 4 }
  0x19   : > { %s277_s16 = scalar_lea.vmem (!%p269_p8), [#allocation6], %s988_s15 }
  0x1d   : > { %312 = sbr.rel (%p989_p9) target bundleno = 37 (0x25), region = 86 }
  0x22   : > { %vm313_vm0 = vcmask 254976   ;;  %v1173_v2 = vmov 0.0  }
  0x23   : > { %314 = vst.msk [vmem:[#allocation2] sm:$0x3] %vm313_vm0, %v1173_v2 }
  0x24   : > { %315 = vst.msk [vmem:[#allocation3] sm:$0x3] %vm313_vm0, %v1173_v2 }
  0x25 PF: > { %v319_v3 = vld [vmem:[%s1351_s1] sm:$0x3]  ;;  %vm328_vm1 = vcmask 1041408   ;;  %v316_v4 = vld [vmem:[%s277_s16] sm:$0xff]  ;;  %vm324_vm2 = vcmask 31744   ;;  %vm375_vm3 = vcmask 261120  }
  0x26   : > { %v317_v5 = vld [vmem:[%s277_s16 + $0x8] sm:$0xff]  ;;  %v330_v6 = vsel %vm328_vm1, %v319_v3, 0  ;;  %vm372_vm4 = vcmask 1041409   ;;  %s1174_s29 = smov 64   ;;  %s1175_s7 = smov 32  }
  0x27   : > { %v318_v7 = vpack.c.bf16 %v317_v5, %v316_v4  ;;  %v1020_v8 = vld [vmem:[%s1352_s2 + $0x8] sm:$0xff]  ;;  %339 = vmatpush.bf16.msra.mxu0 %v330_v6  ;;  %v1019_v9 = vld [vmem:[%s1352_s2] sm:$0xff]  ;;  %s1176_s8 = smov 96   ;;  %p1015_p10 = scmp.ne.s32.totalorder %s1163_s25, 1 }
  0x28   : > { %385 = vmatpush.bf16.msra.mxu1 %v1020_v8  ;;  %453 = vmatpush.bf16.msra.mxu2 %v1020_v8  ;;  %v1067_v12 = vld [vmem:[%s1353_s3] ss:$0 sm:$0xff]  ;;  %s1177_s11 = smov (!%p1015_p10), 96   ;;  %s1178_s12 = smov (!%p1015_p10), 32  }
  0x29   : > { %517 = vmatpush.bf16.msra.mxu3 %v1020_v8  ;;  %s910_s13 = sld [smem:[#allocation5]] (!%p1015_p10) }
  0x2a   : > { %v352_v10 = vld [vmem:[#allocation2] sm:$0x3]  ;;  %990 = vmatmul.msk.bf16.vlgmr.msra.gmra.mxu0 %vm324_vm2, %v318_v7 }
  0x2b   : > { %581 = vmatpush.bf16.msrb.mxu0 %v1020_v8  ;;  %v356_v11 = vpack.c.bf16 %v352_v10, %v352_v10  ;;  %v353_v25 = vld [vmem:[#allocation3] sm:$0x3] }
  0x2c   : > { %386 = vmatpush.bf16.msra.mxu1 %v1019_v9  ;;  %454 = vmatpush.bf16.msra.mxu2 %v1019_v9 }
  0x2d   : > { %518 = vmatpush.bf16.msra.mxu3 %v1019_v9 }
  0x2f   : > { %582 = vmatpush.bf16.msrb.mxu0 %v1019_v9  ;;  %999 = vmatmul.msk.bf16.vlgmr.msra.gmra.mxu1 %vm375_vm3, %v356_v11 }
  0x30   : > { %645 = vmatpush.bf16.msrb.mxu1 %v1020_v8  ;;  %709 = vmatpush.bf16.msrb.mxu2 %v1020_v8 }
  0x31   : > { %773 = vmatpush.bf16.msrb.mxu3 %v1020_v8 }
  0x33   : > { %837 = vmatpush.bf16.msra.mxu0 %v1020_v8 }
  0x34   : > { %646 = vmatpush.bf16.msrb.mxu1 %v1019_v9  ;;  %710 = vmatpush.bf16.msrb.mxu2 %v1019_v9 }
  0x35   : > { %774 = vmatpush.bf16.msrb.mxu3 %v1019_v9 }
  0x37   : > { %838 = vmatpush.bf16.msra.mxu0 %v1019_v9 }
  0xa7   : > { %v341_v13 = vpop.f32.mrf.mxu0 }
  0xa8   : > { %v342_v14 = vadd.f32 %v1067_v12, %v341_v13 }
  0xaa   : > { %346 = vst [vmem:[#allocation4] sm:$0xff] %v342_v14 }
  0xac   : > { %v388_v15 = vpop.f32.mrf.mxu1 }
  0xaf   : > { %v343_v16 = vpop.f32.mrf.mxu0 }
  0xb0   : > { %v344_v17 = vadd.f32 %v1067_v12, %v343_v16 }
  0xb1   : > { %v354_v21 = vld [vmem:[#allocation4] sm:$0x1]  ;;  %v433_v52 = vld [vmem:[#allocation4 + $0x1] sm:$0x1] }
  0xb2   : > { %347 = vst [vmem:[#allocation4 + $0x8] sm:$0xff] %v344_v17 }
  0xb4   : > { %v390_v18 = vpop.f32.mrf.mxu1 }
  0xb9   : > { %v355_v19 = vld [vmem:[#allocation4 + $0x8] sm:$0x1]  ;;  %v434_v50 = vld [vmem:[#allocation4 + $0x9] sm:$0x1]  ;;  %v498_v17 = vld [vmem:[#allocation4 + $0xa] sm:$0x1] }
  0xba   : > { %v371_v20 = vrot.slane %v355_v19, 7  ;;  %v441_v51 = vrot.slane %v434_v50, 7  ;;  %v505_v18 = vrot.slane %v498_v17, 7  ;;  %v497_v19 = vld [vmem:[#allocation4 + $0x2] sm:$0x1] }
  0xbb   : > { %v561_v50 = vld [vmem:[#allocation4 + $0x3] sm:$0x1]  ;;  %v625_v17 = vld [vmem:[#allocation4 + $0x4] sm:$0x1] }
  0xbc   : > { %v373_v22 = vsel %vm372_vm4, %v371_v20, %v354_v21  ;;  %v442_v53 = vsel %vm372_vm4, %v441_v51, %v433_v52  ;;  %v506_v20 = vsel %vm372_vm4, %v505_v18, %v497_v19 }
  0xbd   : > { %v389_v23 = vadd.f32 %v388_v15, %v373_v22 }
  0xbf   : > { %1068 = vtanh.f32 %v389_v23  ;;  %v1000_v26 = vmul.f32 -1.442695, %v389_v23 }
  0xc1   : > { %1070 = vpow2.f32 %v1000_v26 }
  0xc5   : > { %v1069_v24 = vpop.eup %1068 }
  0xc6   : > { %418 = vrot.lane.b32.xlu0 %v1069_v24, %s1174_s29 }
  0xc7   : > { %v1071_v27 = vpop.eup %1070 }
  0xc8   : > { %v395_v28 = vadd.f32 1.0, %v1071_v27 }
  0xca   : > { %1072 = vrcp.f32 %v395_v28  ;;  %v407_v34 = vand.u32 2147483648, %v395_v28  ;;  %vm401_vm6 = vweird.f32 %v395_v28  ;;  %v405_v35 = vand.u32 2147483647, %v395_v28 }
  0xcc   : > { %v408_v37 = vor.u32 1.1754944e-38, %v407_v34  ;;  %vm406_vm8 = vcmp.eq.f32.partialorder %v405_v35, 8.507059e+37 }
  0xce   : > { %413 = vrot.lane.b32.xlu0 %v353_v25, %s1175_s7 }
  0xd0   : > { %v1073_v29 = vpop.eup %1072 }
  0xd1   : > { %v397_v30 = vmul.f32 %v1073_v29, %v395_v28  ;;  %vm402_vm5 = vweird.f32 %v1073_v29 }
  0xd2   : > { %vm403_vm7 = vmor %vm401_vm6, %vm402_vm5 }
  0xd3   : > { %v398_v31 = vsub.f32 1.0, %v397_v30 }
  0xd5   : > { %v399_v32 = vmul.f32 %v1073_v29, %v398_v31 }
  0xd7   : > { %v400_v33 = vadd.f32 %v1073_v29, %v399_v32 }
  0xd9   : > { %v404_v36 = vsel %vm403_vm7, %v1073_v29, %v400_v33 }
  0xda   : > { %v409_v39 = vsel %vm406_vm8, %v408_v37, %v404_v36 }
 0x138   : > { %v419_v38 = vpop.permute.xlu0 %418 }
 0x139   : > { %v421_v40 = vmul.f32 %v419_v38, %v409_v39 }
 0x13b   : > { %423 = vrot.lane.b32.xlu1 %v421_v40, %s1175_s7 }
 0x140   : > { %v414_v41 = vpop.permute.xlu0 %413 }
 0x141   : > { %v416_v42 = vmul.f32 %v414_v41, %v409_v39 }
 0x1ad   : > { %v424_v43 = vpop.permute.xlu1 %423 }
 0x1ae   : > { %v426_v44 = vadd.f32 %v424_v43, %v416_v42 }
 0x1b0   : > { %1074 = vtanh.f32 %v426_v44 }
 0x1b6   : > { %v1075_v45 = vpop.eup %1074 }
 0x1b7   : > { %429 = vrot.lane.b32.xlu1 %v1075_v45, %s1174_s29 }
 0x229   : > { %v430_v46 = vpop.permute.xlu1 %429 }
 0x22a   : > { %v432_v47 = vmul.f32 %v430_v46, %v409_v39 }
 0x22c   : > { %v435_v48 = vpack.c.bf16 %v432_v47, %v432_v47 }
 0x22e   : > { %437 = vrot.lane.b32.xlu2 %v435_v48, %s1175_s7  ;;  %v562_v48 = vld [vmem:[#allocation4 + $0xb] sm:$0x1] }
 0x288   : > { %v438_v49 = vpop.permute.xlu2 %437 }
 0x289   : > { %1001 = vmatmul.msk.bf16.vlgmr.msra.gmra.mxu2 %vm375_vm3, %v438_v49  ;;  %v569_v49 = vrot.slane %v562_v48, 7  ;;  %v689_v48 = vld [vmem:[#allocation4 + $0x5] sm:$0x1] }
 0x28b   : > { %v570_v51 = vsel %vm372_vm4, %v569_v49, %v561_v50 }
 0x30c   : > { %v456_v54 = vpop.f32.mrf.mxu2 }
 0x30d   : > { %v457_v55 = vadd.f32 %v456_v54, %v442_v53 }
 0x30f   : > { %1076 = vtanh.f32 %v457_v55  ;;  %v1002_v58 = vmul.f32 -1.442695, %v457_v55 }
 0x311   : > { %1078 = vpow2.f32 %v1002_v58 }
 0x314   : > { %v458_v56 = vpop.f32.mrf.mxu2 }
 0x315   : > { %v1077_v57 = vpop.eup %1076 }
 0x316   : > { %482 = vrot.lane.b32.xlu2 %v1077_v57, %s1174_s29 }
 0x317   : > { %v1079_v59 = vpop.eup %1078 }
 0x318   : > { %v463_v60 = vadd.f32 1.0, %v1079_v59 }
 0x31a   : > { %1080 = vrcp.f32 %v463_v60  ;;  %v475_v2 = vand.u32 2147483648, %v463_v60  ;;  %vm469_vm10 = vweird.f32 %v463_v60  ;;  %v473_v3 = vand.u32 2147483647, %v463_v60 }
 0x31c   : > { %v476_v5 = vor.u32 1.1754944e-38, %v475_v2  ;;  %vm474_vm12 = vcmp.eq.f32.partialorder %v473_v3, 8.507059e+37 }
 0x320   : > { %v1081_v61 = vpop.eup %1080 }
 0x321   : > { %v465_v62 = vmul.f32 %v1081_v61, %v463_v60  ;;  %vm470_vm9 = vweird.f32 %v1081_v61 }
 0x322   : > { %vm471_vm11 = vmor %vm469_vm10, %vm470_vm9 }
 0x323   : > { %v466_v63 = vsub.f32 1.0, %v465_v62 }
 0x325   : > { %v467_v0 = vmul.f32 %v1081_v61, %v466_v63 }
 0x327   : > { %v468_v1 = vadd.f32 %v1081_v61, %v467_v0 }
 0x329   : > { %v472_v4 = vsel %vm471_vm11, %v1081_v61, %v468_v1 }
 0x32a   : > { %v477_v7 = vsel %vm474_vm12, %v476_v5, %v472_v4 }
 0x32b   : > { %v480_v9 = vmul.f32 %v477_v7, %v426_v44 }
 0x370   : > { %v483_v6 = vpop.permute.xlu2 %482 }
 0x371   : > { %v485_v8 = vmul.f32 %v483_v6, %v477_v7 }
 0x373   : > { %487 = vrot.lane.b32.xlu0 %v485_v8, %s1175_s7 }
 0x3e5   : > { %v488_v10 = vpop.permute.xlu0 %487 }
 0x3e6   : > { %v490_v11 = vadd.f32 %v488_v10, %v480_v9 }
 0x3e8   : > { %1082 = vtanh.f32 %v490_v11 }
 0x3ee   : > { %v1083_v12 = vpop.eup %1082 }
 0x3ef   : > { %493 = vrot.lane.b32.xlu1 %v1083_v12, %s1174_s29 }
 0x461   : > { %v494_v13 = vpop.permute.xlu1 %493 }
 0x462   : > { %v496_v14 = vmul.f32 %v494_v13, %v477_v7 }
 0x464   : > { %v499_v15 = vpack.c.bf16 %v496_v14, %v496_v14 }
 0x466   : > { %501 = vrot.lane.b32.xlu2 %v499_v15, %s1175_s7  ;;  %v626_v15 = vld [vmem:[#allocation4 + $0xc] sm:$0x1] }
 0x4c0   : > { %v502_v16 = vpop.permute.xlu2 %501 }
 0x4c1   : > { %1003 = vmatmul.msk.bf16.vlgmr.msra.gmra.mxu3 %vm375_vm3, %v502_v16  ;;  %v633_v16 = vrot.slane %v626_v15, 7  ;;  %v753_v15 = vld [vmem:[#allocation4 + $0x6] sm:$0x1] }
 0x4c3   : > { %v634_v18 = vsel %vm372_vm4, %v633_v16, %v625_v17 }
 0x544   : > { %v520_v21 = vpop.f32.mrf.mxu3 }
 0x545   : > { %v521_v22 = vadd.f32 %v520_v21, %v506_v20 }
 0x547   : > { %1084 = vtanh.f32 %v521_v22  ;;  %v1004_v25 = vmul.f32 -1.442695, %v521_v22 }
 0x549   : > { %1086 = vpow2.f32 %v1004_v25 }
 0x54c   : > { %v522_v23 = vpop.f32.mrf.mxu3 }
 0x54d   : > { %v1085_v24 = vpop.eup %1084 }
 0x54e   : > { %546 = vrot.lane.b32.xlu0 %v1085_v24, %s1174_s29 }
 0x54f   : > { %v1087_v26 = vpop.eup %1086 }
 0x550   : > { %v527_v27 = vadd.f32 1.0, %v1087_v26 }
 0x552   : > { %1088 = vrcp.f32 %v527_v27  ;;  %v539_v33 = vand.u32 2147483648, %v527_v27  ;;  %vm533_vm14 = vweird.f32 %v527_v27  ;;  %v537_v34 = vand.u32 2147483647, %v527_v27 }
 0x554   : > { %v540_v36 = vor.u32 1.1754944e-38, %v539_v33  ;;  %vm538_vm0 = vcmp.eq.f32.partialorder %v537_v34, 8.507059e+37 }
 0x558   : > { %v1089_v28 = vpop.eup %1088 }
 0x559   : > { %v529_v29 = vmul.f32 %v1089_v28, %v527_v27  ;;  %vm534_vm13 = vweird.f32 %v1089_v28 }
 0x55a   : > { %vm535_vm15 = vmor %vm533_vm14, %vm534_vm13 }
 0x55b   : > { %v530_v30 = vsub.f32 1.0, %v529_v29 }
 0x55d   : > { %v531_v31 = vmul.f32 %v1089_v28, %v530_v30 }
 0x55f   : > { %v532_v32 = vadd.f32 %v1089_v28, %v531_v31 }
 0x561   : > { %v536_v35 = vsel %vm535_vm15, %v1089_v28, %v532_v32 }
 0x562   : > { %v541_v38 = vsel %vm538_vm0, %v540_v36, %v536_v35 }
 0x563   : > { %v544_v40 = vmul.f32 %v541_v38, %v490_v11 }
 0x5c0   : > { %v547_v37 = vpop.permute.xlu0 %546 }
 0x5c1   : > { %v549_v39 = vmul.f32 %v547_v37, %v541_v38 }
 0x5c3   : > { %551 = vrot.lane.b32.xlu1 %v549_v39, %s1175_s7 }
 0x635   : > { %v552_v41 = vpop.permute.xlu1 %551 }
 0x636   : > { %v554_v42 = vadd.f32 %v552_v41, %v544_v40 }
 0x638   : > { %1090 = vtanh.f32 %v554_v42 }
 0x63e   : > { %v1091_v43 = vpop.eup %1090 }
 0x63f   : > { %557 = vrot.lane.b32.xlu2 %v1091_v43, %s1174_s29 }
 0x699   : > { %v558_v44 = vpop.permute.xlu2 %557 }
 0x69a   : > { %v560_v45 = vmul.f32 %v558_v44, %v541_v38 }
 0x69c   : > { %v563_v46 = vpack.c.bf16 %v560_v45, %v560_v45 }
 0x69e   : > { %565 = vrot.lane.b32.xlu0 %v563_v46, %s1175_s7  ;;  %v690_v46 = vld [vmem:[#allocation4 + $0xd] sm:$0x1] }
 0x710   : > { %v566_v47 = vpop.permute.xlu0 %565 }
 0x711   : > { %1005 = vmatmul.msk.bf16.vlgmr.msrb.gmra.mxu0 %vm375_vm3, %v566_v47  ;;  %v697_v47 = vrot.slane %v690_v46, 7  ;;  %v817_v46 = vld [vmem:[#allocation4 + $0x7] sm:$0x1] }
 0x713   : > { %v698_v49 = vsel %vm372_vm4, %v697_v47, %v689_v48 }
 0x78e   : > { %v584_v52 = vpop.f32.mrf.mxu0 }
 0x78f   : > { %v585_v53 = vadd.f32 %v584_v52, %v570_v51 }
 0x791   : > { %1092 = vtanh.f32 %v585_v53  ;;  %v1006_v56 = vmul.f32 -1.442695, %v585_v53 }
 0x793   : > { %1094 = vpow2.f32 %v1006_v56 }
 0x796   : > { %v586_v54 = vpop.f32.mrf.mxu0 }
 0x797   : > { %v1093_v55 = vpop.eup %1092 }
 0x798   : > { %610 = vrot.lane.b32.xlu1 %v1093_v55, %s1174_s29 }
 0x799   : > { %v1095_v57 = vpop.eup %1094 }
 0x79a   : > { %v591_v58 = vadd.f32 1.0, %v1095_v57 }
 0x79c   : > { %1096 = vrcp.f32 %v591_v58  ;;  %v603_v0 = vand.u32 2147483648, %v591_v58  ;;  %vm597_vm2 = vweird.f32 %v591_v58  ;;  %v601_v1 = vand.u32 2147483647, %v591_v58 }
 0x79e   : > { %v604_v3 = vor.u32 1.1754944e-38, %v603_v0  ;;  %vm602_vm6 = vcmp.eq.f32.partialorder %v601_v1, 8.507059e+37 }
 0x7a2   : > { %v1097_v59 = vpop.eup %1096 }
 0x7a3   : > { %v593_v60 = vmul.f32 %v1097_v59, %v591_v58  ;;  %vm598_vm1 = vweird.f32 %v1097_v59 }
 0x7a4   : > { %vm599_vm5 = vmor %vm597_vm2, %vm598_vm1 }
 0x7a5   : > { %v594_v61 = vsub.f32 1.0, %v593_v60 }
 0x7a7   : > { %v595_v62 = vmul.f32 %v1097_v59, %v594_v61 }
 0x7a9   : > { %v596_v63 = vadd.f32 %v1097_v59, %v595_v62 }
 0x7ab   : > { %v600_v2 = vsel %vm599_vm5, %v1097_v59, %v596_v63 }
 0x7ac   : > { %v605_v5 = vsel %vm602_vm6, %v604_v3, %v600_v2 }
 0x7ad   : > { %v608_v7 = vmul.f32 %v605_v5, %v554_v42 }
 0x80a   : > { %v611_v4 = vpop.permute.xlu1 %610 }
 0x80b   : > { %v613_v6 = vmul.f32 %v611_v4, %v605_v5 }
 0x80d   : > { %615 = vrot.lane.b32.xlu2 %v613_v6, %s1175_s7 }
 0x867   : > { %v616_v8 = vpop.permute.xlu2 %615 }
 0x868   : > { %v618_v9 = vadd.f32 %v616_v8, %v608_v7 }
 0x86a   : > { %1098 = vtanh.f32 %v618_v9 }
 0x870   : > { %v1099_v10 = vpop.eup %1098 }
 0x871   : > { %621 = vrot.lane.b32.xlu0 %v1099_v10, %s1174_s29 }
 0x8e3   : > { %v622_v11 = vpop.permute.xlu0 %621 }
 0x8e4   : > { %v624_v12 = vmul.f32 %v622_v11, %v605_v5 }
 0x8e6   : > { %v627_v13 = vpack.c.bf16 %v624_v12, %v624_v12 }
 0x8e8   : > { %629 = vrot.lane.b32.xlu1 %v627_v13, %s1175_s7  ;;  %v754_v13 = vld [vmem:[#allocation4 + $0xe] sm:$0x1] }
 0x95a   : > { %v630_v14 = vpop.permute.xlu1 %629 }
 0x95b   : > { %1007 = vmatmul.msk.bf16.vlgmr.msrb.gmra.mxu1 %vm375_vm3, %v630_v14  ;;  %v761_v14 = vrot.slane %v754_v13, 7 }
 0x95d   : > { %v762_v16 = vsel %vm372_vm4, %v761_v14, %v753_v15 }
 0x9d8   : > { %v648_v19 = vpop.f32.mrf.mxu1 }
 0x9d9   : > { %v649_v20 = vadd.f32 %v648_v19, %v634_v18 }
 0x9db   : > { %1100 = vtanh.f32 %v649_v20  ;;  %v1008_v23 = vmul.f32 -1.442695, %v649_v20 }
 0x9dd   : > { %1102 = vpow2.f32 %v1008_v23 }
 0x9e0   : > { %v650_v21 = vpop.f32.mrf.mxu1 }
 0x9e1   : > { %v1101_v22 = vpop.eup %1100 }
 0x9e2   : > { %674 = vrot.lane.b32.xlu2 %v1101_v22, %s1174_s29 }
 0x9e3   : > { %v1103_v24 = vpop.eup %1102 }
 0x9e4   : > { %v655_v25 = vadd.f32 1.0, %v1103_v24 }
 0x9e6   : > { %1104 = vrcp.f32 %v655_v25  ;;  %v667_v31 = vand.u32 2147483648, %v655_v25  ;;  %vm661_vm8 = vweird.f32 %v655_v25  ;;  %v665_v32 = vand.u32 2147483647, %v655_v25 }
 0x9e8   : > { %v668_v34 = vor.u32 1.1754944e-38, %v667_v31  ;;  %vm666_vm10 = vcmp.eq.f32.partialorder %v665_v32, 8.507059e+37 }
 0x9ec   : > { %v1105_v26 = vpop.eup %1104 }
 0x9ed   : > { %v657_v27 = vmul.f32 %v1105_v26, %v655_v25  ;;  %vm662_vm7 = vweird.f32 %v1105_v26 }
 0x9ee   : > { %vm663_vm9 = vmor %vm661_vm8, %vm662_vm7  ;;  %vm885_vm7 = vcmask 254976  }
 0x9ef   : > { %v658_v28 = vsub.f32 1.0, %v657_v27 }
 0x9f1   : > { %v659_v29 = vmul.f32 %v1105_v26, %v658_v28 }
 0x9f3   : > { %v660_v30 = vadd.f32 %v1105_v26, %v659_v29 }
 0x9f5   : > { %v664_v33 = vsel %vm663_vm9, %v1105_v26, %v660_v30 }
 0x9f6   : > { %v669_v36 = vsel %vm666_vm10, %v668_v34, %v664_v33 }
 0x9f7   : > { %v672_v38 = vmul.f32 %v669_v36, %v618_v9 }
 0xa3c   : > { %v675_v35 = vpop.permute.xlu2 %674 }
 0xa3d   : > { %v677_v37 = vmul.f32 %v675_v35, %v669_v36 }
 0xa3f   : > { %679 = vrot.lane.b32.xlu0 %v677_v37, %s1175_s7 }
 0xab1   : > { %v680_v39 = vpop.permute.xlu0 %679 }
 0xab2   : > { %v682_v40 = vadd.f32 %v680_v39, %v672_v38 }
 0xab4   : > { %1106 = vtanh.f32 %v682_v40 }
 0xaba   : > { %v1107_v41 = vpop.eup %1106 }
 0xabb   : > { %685 = vrot.lane.b32.xlu1 %v1107_v41, %s1174_s29 }
 0xb2d   : > { %v686_v42 = vpop.permute.xlu1 %685 }
 0xb2e   : > { %v688_v43 = vmul.f32 %v686_v42, %v669_v36 }
 0xb30   : > { %v691_v44 = vpack.c.bf16 %v688_v43, %v688_v43 }
 0xb32   : > { %693 = vrot.lane.b32.xlu2 %v691_v44, %s1175_s7  ;;  %v818_v44 = vld [vmem:[#allocation4 + $0xf] sm:$0x1] }
 0xb8c   : > { %v694_v45 = vpop.permute.xlu2 %693 }
 0xb8d   : > { %1009 = vmatmul.msk.bf16.vlgmr.msrb.gmra.mxu2 %vm375_vm3, %v694_v45  ;;  %v825_v45 = vrot.slane %v818_v44, 7 }
 0xb8f   : > { %v826_v47 = vsel %vm372_vm4, %v825_v45, %v817_v46 }
 0xc10   : > { %v712_v50 = vpop.f32.mrf.mxu2 }
 0xc11   : > { %v713_v51 = vadd.f32 %v712_v50, %v698_v49 }
 0xc13   : > { %1108 = vtanh.f32 %v713_v51  ;;  %v1010_v54 = vmul.f32 -1.442695, %v713_v51 }
 0xc15   : > { %1110 = vpow2.f32 %v1010_v54 }
 0xc18   : > { %v714_v52 = vpop.f32.mrf.mxu2 }
 0xc19   : > { %v1109_v53 = vpop.eup %1108 }
 0xc1a   : > { %738 = vrot.lane.b32.xlu0 %v1109_v53, %s1174_s29 }
 0xc1b   : > { %v1111_v55 = vpop.eup %1110 }
 0xc1c   : > { %v719_v56 = vadd.f32 1.0, %v1111_v55 }
 0xc1e   : > { %1112 = vrcp.f32 %v719_v56  ;;  %v731_v62 = vand.u32 2147483648, %v719_v56  ;;  %vm725_vm12 = vweird.f32 %v719_v56  ;;  %v729_v63 = vand.u32 2147483647, %v719_v56 }
 0xc20   : > { %v732_v1 = vor.u32 1.1754944e-38, %v731_v62  ;;  %vm730_vm14 = vcmp.eq.f32.partialorder %v729_v63, 8.507059e+37 }
 0xc24   : > { %v1113_v57 = vpop.eup %1112 }
 0xc25   : > { %v721_v58 = vmul.f32 %v1113_v57, %v719_v56  ;;  %vm726_vm11 = vweird.f32 %v1113_v57 }
 0xc26   : > { %vm727_vm13 = vmor %vm725_vm12, %vm726_vm11 }
 0xc27   : > { %v722_v59 = vsub.f32 1.0, %v721_v58 }
 0xc29   : > { %v723_v60 = vmul.f32 %v1113_v57, %v722_v59 }
 0xc2b   : > { %v724_v61 = vadd.f32 %v1113_v57, %v723_v60 }
 0xc2d   : > { %v728_v0 = vsel %vm727_vm13, %v1113_v57, %v724_v61 }
 0xc2e   : > { %v733_v3 = vsel %vm730_vm14, %v732_v1, %v728_v0 }
 0xc2f   : > { %v736_v5 = vmul.f32 %v733_v3, %v682_v40 }
 0xc8c   : > { %v739_v2 = vpop.permute.xlu0 %738 }
 0xc8d   : > { %v741_v4 = vmul.f32 %v739_v2, %v733_v3 }
 0xc8f   : > { %743 = vrot.lane.b32.xlu1 %v741_v4, %s1175_s7 }
 0xd01   : > { %v744_v6 = vpop.permute.xlu1 %743 }
 0xd02   : > { %v746_v7 = vadd.f32 %v744_v6, %v736_v5 }
 0xd04   : > { %1114 = vtanh.f32 %v746_v7 }
 0xd0a   : > { %v1115_v8 = vpop.eup %1114 }
 0xd0b   : > { %749 = vrot.lane.b32.xlu2 %v1115_v8, %s1174_s29 }
 0xd65   : > { %v750_v9 = vpop.permute.xlu2 %749 }
 0xd66   : > { %v752_v10 = vmul.f32 %v750_v9, %v733_v3 }
 0xd68   : > { %v755_v11 = vpack.c.bf16 %v752_v10, %v752_v10 }
 0xd6a   : > { %757 = vrot.lane.b32.xlu0 %v755_v11, %s1175_s7 }
 0xddc   : > { %v758_v12 = vpop.permute.xlu0 %757 }
 0xddd   : > { %1011 = vmatmul.msk.bf16.vlgmr.msrb.gmra.mxu3 %vm375_vm3, %v758_v12 }
 0xe60   : > { %v776_v17 = vpop.f32.mrf.mxu3 }
 0xe61   : > { %v777_v18 = vadd.f32 %v776_v17, %v762_v16 }
 0xe63   : > { %1116 = vtanh.f32 %v777_v18  ;;  %v1012_v21 = vmul.f32 -1.442695, %v777_v18 }
 0xe65   : > { %1118 = vpow2.f32 %v1012_v21 }
 0xe68   : > { %v778_v19 = vpop.f32.mrf.mxu3 }
 0xe69   : > { %v1117_v20 = vpop.eup %1116 }
 0xe6a   : > { %802 = vrot.lane.b32.xlu1 %v1117_v20, %s1174_s29 }
 0xe6b   : > { %v1119_v22 = vpop.eup %1118 }
 0xe6c   : > { %v783_v23 = vadd.f32 1.0, %v1119_v22 }
 0xe6e   : > { %1120 = vrcp.f32 %v783_v23  ;;  %v795_v29 = vand.u32 2147483648, %v783_v23  ;;  %vm789_vm0 = vweird.f32 %v783_v23  ;;  %v793_v30 = vand.u32 2147483647, %v783_v23 }
 0xe70   : > { %v796_v32 = vor.u32 1.1754944e-38, %v795_v29  ;;  %vm794_vm2 = vcmp.eq.f32.partialorder %v793_v30, 8.507059e+37 }
 0xe74   : > { %v1121_v24 = vpop.eup %1120 }
 0xe75   : > { %v785_v25 = vmul.f32 %v1121_v24, %v783_v23  ;;  %vm790_vm15 = vweird.f32 %v1121_v24 }
 0xe76   : > { %vm791_vm1 = vmor %vm789_vm0, %vm790_vm15 }
 0xe77   : > { %v786_v26 = vsub.f32 1.0, %v785_v25 }
 0xe79   : > { %v787_v27 = vmul.f32 %v1121_v24, %v786_v26 }
 0xe7b   : > { %v788_v28 = vadd.f32 %v1121_v24, %v787_v27 }
 0xe7d   : > { %v792_v31 = vsel %vm791_vm1, %v1121_v24, %v788_v28 }
 0xe7e   : > { %v797_v34 = vsel %vm794_vm2, %v796_v32, %v792_v31 }
 0xe7f   : > { %v800_v36 = vmul.f32 %v797_v34, %v746_v7 }
 0xedc   : > { %v803_v33 = vpop.permute.xlu1 %802 }
 0xedd   : > { %v805_v35 = vmul.f32 %v803_v33, %v797_v34 }
 0xedf   : > { %807 = vrot.lane.b32.xlu2 %v805_v35, %s1175_s7 }
 0xf39   : > { %v808_v37 = vpop.permute.xlu2 %807 }
 0xf3a   : > { %v810_v38 = vadd.f32 %v808_v37, %v800_v36 }
 0xf3c   : > { %1122 = vtanh.f32 %v810_v38 }
 0xf42   : > { %v1123_v39 = vpop.eup %1122 }
 0xf43   : > { %813 = vrot.lane.b32.xlu0 %v1123_v39, %s1174_s29 }
 0xfb5   : > { %v814_v40 = vpop.permute.xlu0 %813 }
 0xfb6   : > { %v816_v41 = vmul.f32 %v814_v40, %v797_v34 }
 0xfb8   : > { %v819_v42 = vpack.c.bf16 %v816_v41, %v816_v41 }
 0xfba   : > { %821 = vrot.lane.b32.xlu1 %v819_v42, %s1175_s7 }
0x102c   : > { %v822_v43 = vpop.permute.xlu1 %821 }
0x102d   : > { %1013 = vmatmul.msk.bf16.vlgmr.msra.gmra.mxu0 %vm375_vm3, %v822_v43 }
0x10aa   : > { %v840_v48 = vpop.f32.mrf.mxu0 }
0x10ab   : > { %v841_v49 = vadd.f32 %v840_v48, %v826_v47 }
0x10ad   : > { %1124 = vtanh.f32 %v841_v49  ;;  %v1014_v52 = vmul.f32 -1.442695, %v841_v49 }
0x10af   : > { %1126 = vpow2.f32 %v1014_v52 }
0x10b2   : > { %v842_v50 = vpop.f32.mrf.mxu0 }
0x10b3   : > { %v1125_v51 = vpop.eup %1124 }
0x10b4   : > { %866 = vrot.lane.b32.xlu2 %v1125_v51, %s1174_s29 }
0x10b5   : > { %v1127_v53 = vpop.eup %1126 }
0x10b6   : > { %v847_v54 = vadd.f32 1.0, %v1127_v53 }
0x10b8   : > { %1128 = vrcp.f32 %v847_v54  ;;  %v859_v60 = vand.u32 2147483648, %v847_v54  ;;  %vm853_vm4 = vweird.f32 %v847_v54  ;;  %v857_v61 = vand.u32 2147483647, %v847_v54 }
0x10ba   : > { %v860_v63 = vor.u32 1.1754944e-38, %v859_v60  ;;  %vm858_vm6 = vcmp.eq.f32.partialorder %v857_v61, 8.507059e+37 }
0x10be   : > { %v1129_v55 = vpop.eup %1128 }
0x10bf   : > { %v849_v56 = vmul.f32 %v1129_v55, %v847_v54  ;;  %vm854_vm3 = vweird.f32 %v1129_v55 }
0x10c0   : > { %vm855_vm5 = vmor %vm853_vm4, %vm854_vm3 }
0x10c1   : > { %v850_v57 = vsub.f32 1.0, %v849_v56 }
0x10c3   : > { %v851_v58 = vmul.f32 %v1129_v55, %v850_v57 }
0x10c5   : > { %v852_v59 = vadd.f32 %v1129_v55, %v851_v58 }
0x10c7   : > { %v856_v62 = vsel %vm855_vm5, %v1129_v55, %v852_v59 }
0x10c8   : > { %v861_v1 = vsel %vm858_vm6, %v860_v63, %v856_v62 }
0x10c9   : > { %v864_v3 = vmul.f32 %v861_v1, %v810_v38 }
0x110e   : > { %v867_v0 = vpop.permute.xlu2 %866 }
0x110f   : > { %v869_v2 = vmul.f32 %v867_v0, %v861_v1 }
0x1111   : > { %871 = vrot.lane.b32.xlu0 %v869_v2, %s1175_s7 }
0x1183   : > { %v872_v4 = vpop.permute.xlu0 %871 }
0x1184   : > { %v874_v5 = vadd.f32 %v872_v4, %v864_v3 }
0x1186   : > { %1130 = vtanh.f32 %v874_v5  ;;  %888 = vrot.lane.b32.xlu0 %v874_v5, %s1176_s8 }
0x118c   : > { %v1131_v6 = vpop.eup %1130 }
0x118d   : > { %877 = vrot.lane.b32.xlu1 %v1131_v6, %s1174_s29 }
0x11f8   : > { %v889_v7 = vpop.permute.xlu0 %888 }
0x11f9   : > { %891 = vst.msk [vmem:[#allocation3] sm:$0x3] %vm885_vm7, %v889_v7 }
0x11ff   : > { %v878_v8 = vpop.permute.xlu1 %877 }
0x1200   : > { %v880_v9 = vmul.f32 %v878_v8, %v861_v1 }
0x1202   : > { %882 = vrot.lane.b32.xlu2 %v880_v9, %s1175_s7 }
0x1259   : > { %895 = sbr.rel (%p1015_p10) target bundleno = 5055 (0x13bf), region = 90 }
0x125c   : > { %v883_v10 = vpop.permute.xlu2 %882 }
0x125d   : > { %886 = vst.msk [vmem:[#allocation2] sm:$0x3] %vm885_vm7, %v883_v10 }
0x125e   : > { %v1132_v11 = vld [vmem:[%s1354_s4] ss:$0 sm:$0xff]  ;;  %v911_v16 = vstv %s910_s13  ;;  %vm913_vm8 = vcmask 1024  }
0x125f   : > { %899 = vrot.lane.b32.xlu0 %v1132_v11, %s1177_s11 }
0x12d1   : > { %v900_v12 = vpop.permute.xlu0 %899 }
0x12d2   : > { %v902_v13 = vmul.f32 %v900_v12, %v880_v9 }
0x12d4   : > { %904 = vrot.lane.b32.xlu0 %v902_v13, %s1178_s12 }
0x1346   : > { %v905_v14 = vpop.permute.xlu0 %904 }
0x1347   : > { %v907_v15 = vsel %vm885_vm7, %v905_v14, 0.0 }
0x1348   : > { %908 = vadd.xlane.f32.xlu1 %v907_v15 }
0x13bb   : > { %v909_v17 = vpop.xlane.xlu1 %908 }
0x13bc   : > { %v912_v18 = vadd.f32 %v911_v16, %v909_v17 }
0x13be   : > { %914 = vst.msk [vmem:[%s1356_s6] sm:$0x3] %vm913_vm8, %v912_v18 }
0x13bf PF: > { %s17_s27 = sadd.s32 1, %s1171_s27   ;;  %s1357_s23 = smov %s1159_s24 }
0x13c0   : > { %p14_p11 = scmp.ge.s32.totalorder %s17_s27, 4   ;;  %s1358_s24 = smov %s1252_s30 }
0x13c1   : > { %s1359_s25 = smov %s1167_s26  ;;  %s1360_s26 = smov %s1362_s5 }
0x13c2   :  { %16 = sbr.rel (!%p14_p11) target bundleno = 5 (0x5), region = 125 }

</bundles_post_ra>
